<compile_context>
chip_gen: v5e
topology: v5e:2x2
jax: 0.10.0
libtpu: 0.0.40
codegen_flags: <defaults>
</compile_context>

<pallas_src>
from functools import partial

import jax
import jax.numpy as jnp
from jax.experimental import pallas as pl
from jax.experimental.pallas import tpu as pltpu

IN_F = 28 * 28        # 784
K_PAD = 896           # 7 * 128 (lane-aligned K)
HID = 256
OUT_F = 10
N_PAD = 128           # lane-dense output width


def _round_up(n, m):
    return ((n + m - 1) // m) * m


def _mlp_kernel(x_ref, w1_ref, b1_ref, w2_ref, b2_ref, o_ref):
    # x_ref:  (TB, 896)  bf16      w1_ref: (896, 256) bf16   b1_ref: (1, 256) f32
    # w2_ref: (256, 128) bf16      b2_ref: (1, 128)  f32     o_ref:  (TB, 128) f32
    # layer1 on MXU (bf16 in, f32 accumulate), bias + ReLU on VPU in f32.
    h = jnp.dot(x_ref[...], w1_ref[...], preferred_element_type=jnp.float32)
    h = jnp.maximum(h + b1_ref[...], 0.0)
    # layer2 (padded to 128 lanes -> unmasked full-lane stores).
    out = jnp.dot(h.astype(jnp.bfloat16), w2_ref[...],
                  preferred_element_type=jnp.float32)
    o_ref[...] = out + b2_ref[...]


@partial(jax.jit, static_argnames=("tb",))
def network_forward(x, w1, b1, w2, b2, *, tb=512):
    """x: any shape that flattens to (-1, 784); returns (B, 10) float32.

    w1: (784, 256), b1: (256,), w2: (256, 10), b2: (10,)  -- stored as (in, out),
    equivalent to PyTorch's x @ W.T + b.
    """
    x2d = x.reshape(-1, IN_F).astype(jnp.float32)
    B = x2d.shape[0]

    # Batch tile: multiple of 8 (sublane), capped at `tb` (512 is safe under the
    # 16/32 MiB scoped-VMEM defaults on v5e/v6e/v7x with double buffering).
    TB = min(tb, _round_up(B, 8))
    B_pad = _round_up(B, TB)
    grid = (pl.cdiv(B_pad, TB),)

    # --- wrapper-side padding / dtype prep (fused by XLA under jit) ---
    x_p = jnp.pad(x2d, ((0, B_pad - B), (0, K_PAD - IN_F))).astype(jnp.bfloat16)
    w1_p = jnp.pad(w1.astype(jnp.float32),
                   ((0, K_PAD - IN_F), (0, 0))).astype(jnp.bfloat16)
    w2_p = jnp.pad(w2.astype(jnp.float32),
                   ((0, 0), (0, N_PAD - OUT_F))).astype(jnp.bfloat16)
    b1_p = b1.astype(jnp.float32).reshape(1, HID)
    b2_p = jnp.pad(b2.astype(jnp.float32), (0, N_PAD - OUT_F)).reshape(1, N_PAD)

    out_pad = pl.pallas_call(
        _mlp_kernel,
        out_shape=jax.ShapeDtypeStruct((B_pad, N_PAD), jnp.float32),
        grid=grid,
        in_specs=[
            pl.BlockSpec((TB, K_PAD), lambda i: (i, 0)),    # x tile   (pipelined)
            pl.BlockSpec((K_PAD, HID), lambda i: (0, 0)),   # w1       (resident)
            pl.BlockSpec((1, HID), lambda i: (0, 0)),       # b1       (resident)
            pl.BlockSpec((HID, N_PAD), lambda i: (0, 0)),   # w2       (resident)
            pl.BlockSpec((1, N_PAD), lambda i: (0, 0)),     # b2       (resident)
        ],
        out_specs=pl.BlockSpec((TB, N_PAD), lambda i: (i, 0)),
        compiler_params=pltpu.CompilerParams(
            dimension_semantics=("parallel",),
            vmem_limit_bytes=32 * 1024 * 1024,
        ),
    )(x_p, w1_p, b1_p, w2_p, b2_p)

    return out_pad[:B, :OUT_F]


def init_params(key):
    """Deterministic init mimicking PyTorch nn.Linear defaults (U(-1/sqrt(fan_in), +))."""
    k1, k2, k3, k4 = jax.random.split(key, 4)
    fan1, fan2 = IN_F, HID
    lim1 = 1.0 / jnp.sqrt(fan1)
    lim2 = 1.0 / jnp.sqrt(fan2)
    # stored as (in, out) — i.e. transposed relative to PyTorch's (out, in)
    w1 = jax.random.uniform(k1, (fan1, HID), jnp.float32, -lim1, lim1)
    b1 = jax.random.uniform(k2, (HID,), jnp.float32, -lim1, lim1)
    w2 = jax.random.uniform(k3, (fan2, OUT_F), jnp.float32, -lim2, lim2)
    b2 = jax.random.uniform(k4, (OUT_F,), jnp.float32, -lim2, lim2)
    return w1, b1, w2, b2


if __name__ == "__main__":
    key = jax.random.PRNGKey(0)
    kx, kp = jax.random.split(key)

    # Small MNIST-like batch: (B, 1, 28, 28) — forward flattens to (B, 784).
    x = jax.random.normal(kx, (2, 1, 28, 28), jnp.float32)
    w1, b1, w2, b2 = init_params(kp)

    out = network_forward(x, w1, b1, w2, b2)
    out = jax.block_until_ready(out)

    # Pure-JAX reference matching the kernel's precision pipeline
    # (bf16 MXU inputs, f32 accumulation, f32 bias/ReLU).
    x2d = x.reshape(-1, IN_F)
    h_ref = jnp.dot(x2d.astype(jnp.bfloat16), w1.astype(jnp.bfloat16),
                    preferred_element_type=jnp.float32) + b1
    h_ref = jnp.maximum(h_ref, 0.0)
    ref = jnp.dot(h_ref.astype(jnp.bfloat16), w2.astype(jnp.bfloat16),
                  preferred_element_type=jnp.float32) + b2

    assert out.shape == (2, OUT_F)
    assert jnp.allclose(out, ref, atol=1e-3, rtol=1e-3)

    # Sanity against the full-f32 math (looser: bf16 inputs on a 784-deep dot).
    ref_f32 = jnp.maximum(x2d @ w1 + b1, 0.0) @ w2 + b2
    assert jnp.allclose(out, ref_f32, atol=5e-2, rtol=5e-2)

    print("KERNEL_OK")
</pallas_src>

<mosaic_0001>
module attributes {stable_mosaic.version = 11 : i64} {
  func.func @_mlp_kernel(%arg0: i32, %arg1: memref<8x896xbf16, #tpu.memory_space<vmem>>, %arg2: memref<896x256xbf16, #tpu.memory_space<vmem>>, %arg3: memref<1x256xf32, #tpu.memory_space<vmem>>, %arg4: memref<256x128xbf16, #tpu.memory_space<vmem>>, %arg5: memref<1x128xf32, #tpu.memory_space<vmem>>, %arg6: memref<8x128xf32, #tpu.memory_space<vmem>>) attributes {dimension_semantics = [#tpu.dimension_semantics<parallel>], iteration_bounds = array<i64: 1>, scalar_prefetch = 0 : i64, scratch_operands = 0 : i64, tpu.core_type = #tpu.core_type<tc>, window_params = [{transform_indices = @transform_0, window_bounds = array<i64: 8, 896>}, {pipeline_mode = #tpu.pipeline_mode<synchronous>, transform_indices = @transform_1, window_bounds = array<i64: 896, 256>}, {pipeline_mode = #tpu.pipeline_mode<synchronous>, transform_indices = @transform_2, window_bounds = array<i64: 1, 256>}, {pipeline_mode = #tpu.pipeline_mode<synchronous>, transform_indices = @transform_3, window_bounds = array<i64: 256, 128>}, {pipeline_mode = #tpu.pipeline_mode<synchronous>, transform_indices = @transform_4, window_bounds = array<i64: 1, 128>}, {transform_indices = @transform_5, window_bounds = array<i64: 8, 128>}]} {
    %c0 = arith.constant 0 : index
    %c0_0 = arith.constant 0 : index
    %0 = vector.load %arg1[%c0, %c0_0] : memref<8x896xbf16, #tpu.memory_space<vmem>>, vector<8x896xbf16>
    %c0_1 = arith.constant 0 : index
    %c0_2 = arith.constant 0 : index
    %1 = vector.load %arg2[%c0_1, %c0_2] : memref<896x256xbf16, #tpu.memory_space<vmem>>, vector<896x256xbf16>
    %cst = arith.constant dense<0.000000e+00> : vector<8x256xf32>
    %2 = tpu.matmul %0, %1, %cst {dimension_numbers = #tpu.dot_dimension_numbers<[1], [0], [0], [1], [0, 0, 1, 1], [], []>} : vector<8x896xbf16>, vector<896x256xbf16>, vector<8x256xf32> -> vector<8x256xf32>
    %c0_3 = arith.constant 0 : index
    %c0_4 = arith.constant 0 : index
    %3 = vector.load %arg3[%c0_3, %c0_4] : memref<1x256xf32, #tpu.memory_space<vmem>>, vector<1x256xf32>
    %4 = vector.broadcast %3 : vector<1x256xf32> to vector<8x256xf32>
    %5 = arith.addf %2, %4 : vector<8x256xf32>
    %cst_5 = arith.constant 0.000000e+00 : f32
    %6 = vector.broadcast %cst_5 : f32 to vector<8x256xf32>
    %7 = arith.maximumf %5, %6 : vector<8x256xf32>
    %8 = arith.truncf %7 : vector<8x256xf32> to vector<8x256xbf16>
    %c0_6 = arith.constant 0 : index
    %c0_7 = arith.constant 0 : index
    %9 = vector.load %arg4[%c0_6, %c0_7] : memref<256x128xbf16, #tpu.memory_space<vmem>>, vector<256x128xbf16>
    %cst_8 = arith.constant dense<0.000000e+00> : vector<8x128xf32>
    %10 = tpu.matmul %8, %9, %cst_8 {dimension_numbers = #tpu.dot_dimension_numbers<[1], [0], [0], [1], [0, 0, 1, 1], [], []>} : vector<8x256xbf16>, vector<256x128xbf16>, vector<8x128xf32> -> vector<8x128xf32>
    %c0_9 = arith.constant 0 : index
    %c0_10 = arith.constant 0 : index
    %11 = vector.load %arg5[%c0_9, %c0_10] : memref<1x128xf32, #tpu.memory_space<vmem>>, vector<1x128xf32>
    %12 = vector.broadcast %11 : vector<1x128xf32> to vector<8x128xf32>
    %13 = arith.addf %10, %12 : vector<8x128xf32>
    %c0_11 = arith.constant 0 : index
    %c0_12 = arith.constant 0 : index
    %14 = vector.load %arg6[%c0_11, %c0_12] : memref<8x128xf32, #tpu.memory_space<vmem>>, vector<8x128xf32>
    tpu.vector_store %arg6[%c0_11, %c0_12], %13 {strides = array<i32>} : memref<8x128xf32, #tpu.memory_space<vmem>>, vector<8x128xf32>,
    return
  }
  func.func @transform_0(%arg0: i32) -> (i32, i32) {
    %c0_i32 = arith.constant 0 : i32
    %c0_i32_0 = arith.constant 0 : i32
    return %arg0, %c0_i32 : i32, i32
  }
  func.func @transform_1(%arg0: i32) -> (i32, i32) {
    %c0_i32 = arith.constant 0 : i32
    %c0_i32_0 = arith.constant 0 : i32
    %c0_i32_1 = arith.constant 0 : i32
    return %c0_i32, %c0_i32_0 : i32, i32
  }
  func.func @transform_2(%arg0: i32) -> (i32, i32) {
    %c0_i32 = arith.constant 0 : i32
    %c0_i32_0 = arith.constant 0 : i32
    %c0_i32_1 = arith.constant 0 : i32
    return %c0_i32, %c0_i32_0 : i32, i32
  }
  func.func @transform_3(%arg0: i32) -> (i32, i32) {
    %c0_i32 = arith.constant 0 : i32
    %c0_i32_0 = arith.constant 0 : i32
    %c0_i32_1 = arith.constant 0 : i32
    return %c0_i32, %c0_i32_0 : i32, i32
  }
  func.func @transform_4(%arg0: i32) -> (i32, i32) {
    %c0_i32 = arith.constant 0 : i32
    %c0_i32_0 = arith.constant 0 : i32
    %c0_i32_1 = arith.constant 0 : i32
    return %c0_i32, %c0_i32_0 : i32, i32
  }
  func.func @transform_5(%arg0: i32) -> (i32, i32) {
    %c0_i32 = arith.constant 0 : i32
    %c0_i32_0 = arith.constant 0 : i32
    return %arg0, %c0_i32 : i32, i32
  }
}

</mosaic_0001>

<bundles_post_ra>
// kernel: network_forward.1
= control target key start
LH: loop header
LB: loop body
LE: loop exit
PB: predicated region body
PF: predicated region fallthrough
CT: control target
= control target key end

     0   :  { %s2516_s1 = inlined_call_operand.vmem [shape: bf16[896,256], index: 1, kind: input, shape index: {}]   ;;  %s2517_s0 = inlined_call_operand.vmem [shape: bf16[8,896], index: 0, kind: input, shape index: {}]   ;;  %s2518_s3 = inlined_call_operand.vmem [shape: bf16[256,128], index: 3, kind: input, shape index: {}]   ;;  %s2519_s4 = inlined_call_operand.vmem [shape: f32[1,128], index: 4, kind: input, shape index: {}]   ;;  %s2520_s2 = inlined_call_operand.vmem [shape: f32[1,256], index: 2, kind: input, shape index: {}]   ;;  %s2521_s5 = inlined_call_operand.vmem [shape: f32[8,128], index: 5, kind: output, shape index: {}]  }
   0x1   :  { %v1134_v0 = vld [vmem:[%s2516_s1 + $0x70] sm:$0xf]  ;;  %v1603_v1 = vld [vmem:[%s2516_s1 + $0x74] sm:$0xf0]  ;;  %v1126_v9 = vld [vmem:[%s2516_s1 + $0x60] sm:$0xf] }
   0x2   :  { %v1198_v2 = vld [vmem:[%s2516_s1 + $0xf0] sm:$0xf]  ;;  %v1135_v3 = vor.u32 %v1603_v1, %v1134_v0  ;;  %v1619_v4 = vld [vmem:[%s2516_s1 + $0xf4] sm:$0xf0]  ;;  %v1601_v10 = vld [vmem:[%s2516_s1 + $0x64] sm:$0xf0] }
   0x3   :  { %v1262_v5 = vld [vmem:[%s2516_s1 + $0x170] sm:$0xf]  ;;  %v1635_v6 = vld [vmem:[%s2516_s1 + $0x174] sm:$0xf0]  ;;  %v1199_v7 = vor.u32 %v1619_v4, %v1198_v2  ;;  %v1190_v11 = vld [vmem:[%s2516_s1 + $0xe0] sm:$0xf]  ;;  %v1127_v12 = vor.u32 %v1601_v10, %v1126_v9 }
   0x4   :  { %v1263_v8 = vor.u32 %v1635_v6, %v1262_v5  ;;  %727 = vmatpush.bf16.msra.mxu0 %v1135_v3  ;;  %v1617_v13 = vld [vmem:[%s2516_s1 + $0xe4] sm:$0xf0]  ;;  %v1254_v14 = vld [vmem:[%s2516_s1 + $0x160] sm:$0xf]  ;;  %v1118_v18 = vld [vmem:[%s2516_s1 + $0x50] sm:$0xf] }
   0x5   :  { %v1633_v15 = vld [vmem:[%s2516_s1 + $0x164] sm:$0xf0]  ;;  %740 = vmatpush.bf16.msra.mxu1 %v1199_v7  ;;  %v1191_v16 = vor.u32 %v1617_v13, %v1190_v11  ;;  %v1599_v19 = vld [vmem:[%s2516_s1 + $0x54] sm:$0xf0]  ;;  %v1182_v20 = vld [vmem:[%s2516_s1 + $0xd0] sm:$0xf] }
   0x6   :  { %753 = vmatpush.bf16.msra.mxu2 %v1263_v8  ;;  %v1255_v17 = vor.u32 %v1633_v15, %v1254_v14  ;;  %v1615_v21 = vld [vmem:[%s2516_s1 + $0xd4] sm:$0xf0]  ;;  %v1246_v22 = vld [vmem:[%s2516_s1 + $0x150] sm:$0xf]  ;;  %v1119_v24 = vor.u32 %v1599_v19, %v1118_v18  ;;  %v1110_v25 = vld [vmem:[%s2516_s1 + $0x40] sm:$0xf] }
   0x7   :  { %v1631_v23 = vld [vmem:[%s2516_s1 + $0x154] sm:$0xf0]  ;;  %v1597_v26 = vld [vmem:[%s2516_s1 + $0x44] sm:$0xf0]  ;;  %v1183_v27 = vor.u32 %v1615_v21, %v1182_v20  ;;  %v1174_v29 = vld [vmem:[%s2516_s1 + $0xc0] sm:$0xf] }
   0x8   :  { %728 = vmatpush.bf16.msra.mxu0 %v1127_v12  ;;  %v1247_v28 = vor.u32 %v1631_v23, %v1246_v22  ;;  %v1326_v30 = vld [vmem:[%s2516_s1 + $0x1f0] sm:$0xf]  ;;  %v1651_v31 = vld [vmem:[%s2516_s1 + $0x1f4] sm:$0xf0]  ;;  %v1613_v32 = vld [vmem:[%s2516_s1 + $0xc4] sm:$0xf0]  ;;  %v1111_v37 = vor.u32 %v1597_v26, %v1110_v25 }
   0x9   :  { %741 = vmatpush.bf16.msra.mxu1 %v1191_v16  ;;  %v1238_v33 = vld [vmem:[%s2516_s1 + $0x140] sm:$0xf]  ;;  %v1629_v34 = vld [vmem:[%s2516_s1 + $0x144] sm:$0xf0]  ;;  %v1327_v35 = vor.u32 %v1651_v31, %v1326_v30  ;;  %v1102_v38 = vld [vmem:[%s2516_s1 + $0x30] sm:$0xf]  ;;  %v1175_v41 = vor.u32 %v1613_v32, %v1174_v29 }
   0xa   :  { %754 = vmatpush.bf16.msra.mxu2 %v1255_v17  ;;  %v1318_v36 = vld [vmem:[%s2516_s1 + $0x1e0] sm:$0xf]  ;;  %v1595_v39 = vld [vmem:[%s2516_s1 + $0x34] sm:$0xf0]  ;;  %v1649_v40 = vld [vmem:[%s2516_s1 + $0x1e4] sm:$0xf0]  ;;  %v1239_v42 = vor.u32 %v1629_v34, %v1238_v33 }
   0xb   :  { %766 = vmatpush.bf16.msra.mxu3 %v1327_v35  ;;  %v1166_v43 = vld [vmem:[%s2516_s1 + $0xb0] sm:$0xf]  ;;  %v1611_v44 = vld [vmem:[%s2516_s1 + $0xb4] sm:$0xf0]  ;;  %v1319_v46 = vor.u32 %v1649_v40, %v1318_v36  ;;  %v1103_v50 = vor.u32 %v1595_v39, %v1102_v38  ;;  %v1094_v51 = vld [vmem:[%s2516_s1 + $0x20] sm:$0xf] }
   0xc   :  { %729 = vmatpush.bf16.msra.mxu0 %v1119_v24  ;;  %v1230_v45 = vld [vmem:[%s2516_s1 + $0x130] sm:$0xf]  ;;  %v1627_v47 = vld [vmem:[%s2516_s1 + $0x134] sm:$0xf0]  ;;  %v1593_v52 = vld [vmem:[%s2516_s1 + $0x24] sm:$0xf0]  ;;  %v1167_v54 = vor.u32 %v1611_v44, %v1166_v43 }
   0xd   :  { %742 = vmatpush.bf16.msra.mxu1 %v1183_v27  ;;  %v1310_v48 = vld [vmem:[%s2516_s1 + $0x1d0] sm:$0xf]  ;;  %v1647_v49 = vld [vmem:[%s2516_s1 + $0x1d4] sm:$0xf0]  ;;  %v1231_v55 = vor.u32 %v1627_v47, %v1230_v45  ;;  %v1158_v56 = vld [vmem:[%s2516_s1 + $0xa0] sm:$0xf]  ;;  %v1095_v62 = vor.u32 %v1593_v52, %v1094_v51 }
   0xe   :  { %755 = vmatpush.bf16.msra.mxu2 %v1247_v28  ;;  %v1311_v53 = vor.u32 %v1647_v49, %v1310_v48  ;;  %v1302_v57 = vld [vmem:[%s2516_s1 + $0x1c0] sm:$0xf]  ;;  %v1645_v58 = vld [vmem:[%s2516_s1 + $0x1c4] sm:$0xf0]  ;;  %v1086_v63 = vld [vmem:[%s2516_s1 + $0x10] sm:$0xf] }
   0xf   :  { %767 = vmatpush.bf16.msra.mxu3 %v1319_v46  ;;  %v1609_v59 = vld [vmem:[%s2516_s1 + $0xa4] sm:$0xf0]  ;;  %v1222_v60 = vld [vmem:[%s2516_s1 + $0x120] sm:$0xf]  ;;  %v1591_v0 = vld [vmem:[%s2516_s1 + $0x14] sm:$0xf0]  ;;  %v1303_v1 = vor.u32 %v1645_v58, %v1302_v57 }
  0x10   :  { %730 = vmatpush.bf16.msra.mxu0 %v1111_v37  ;;  %v1625_v61 = vld [vmem:[%s2516_s1 + $0x124] sm:$0xf0]  ;;  %v1159_v2 = vor.u32 %v1609_v59, %v1158_v56  ;;  %v1150_v4 = vld [vmem:[%s2516_s1 + $0x90] sm:$0xf]  ;;  %v1643_v6 = vld [vmem:[%s2516_s1 + $0x1b4] sm:$0xf0]  ;;  %v1087_v10 = vor.u32 %v1591_v0, %v1086_v63 }
  0x11   :  { %743 = vmatpush.bf16.msra.mxu1 %v1175_v41  ;;  %v1223_v3 = vor.u32 %v1625_v61, %v1222_v60  ;;  %v1294_v5 = vld [vmem:[%s2516_s1 + $0x1b0] sm:$0xf]  ;;  %v1607_v7 = vld [vmem:[%s2516_s1 + $0x94] sm:$0xf0]  ;;  %v1078_v11 = vld [vmem:[%s2516_s1] sm:$0xf] }
  0x12   :  { %756 = vmatpush.bf16.msra.mxu2 %v1239_v42  ;;  %v1214_v8 = vld [vmem:[%s2516_s1 + $0x110] sm:$0xf]  ;;  %v1623_v9 = vld [vmem:[%s2516_s1 + $0x114] sm:$0xf0]  ;;  %v1589_v12 = vld [vmem:[%s2516_s1 + $0x4] sm:$0xf0]  ;;  %v1295_v14 = vor.u32 %v1643_v6, %v1294_v5  ;;  %v1151_v15 = vor.u32 %v1607_v7, %v1150_v4 }
  0x13   :  { %768 = vmatpush.bf16.msra.mxu3 %v1311_v53  ;;  %v1142_v13 = vld [vmem:[%s2516_s1 + $0x80] sm:$0xf]  ;;  %v1215_v16 = vor.u32 %v1623_v9, %v1214_v8  ;;  %v1605_v17 = vld [vmem:[%s2516_s1 + $0x84] sm:$0xf0]  ;;  %v1390_v22 = vld [vmem:[%s2516_s1 + $0x270] sm:$0xf]  ;;  %v1079_v26 = vor.u32 %v1589_v12, %v1078_v11 }
  0x14   :  { %731 = vmatpush.bf16.msra.mxu0 %v1103_v50  ;;  %v1286_v18 = vld [vmem:[%s2516_s1 + $0x1a0] sm:$0xf]  ;;  %v1641_v19 = vld [vmem:[%s2516_s1 + $0x1a4] sm:$0xf0]  ;;  %v1667_v23 = vld [vmem:[%s2516_s1 + $0x274] sm:$0xf0]  ;;  %v1143_v30 = vor.u32 %v1605_v17, %v1142_v13 }
  0x15   :  { %744 = vmatpush.bf16.msra.mxu1 %v1167_v54  ;;  %v1206_v20 = vld [vmem:[%s2516_s1 + $0x100] sm:$0xf]  ;;  %v1621_v21 = vld [vmem:[%s2516_s1 + $0x104] sm:$0xf0]  ;;  %v1454_v24 = vld [vmem:[%s2516_s1 + $0x2f0] sm:$0xf]  ;;  %v1287_v29 = vor.u32 %v1641_v19, %v1286_v18  ;;  %v1391_v34 = vor.u32 %v1667_v23, %v1390_v22 }
  0x16   :  { %757 = vmatpush.bf16.msra.mxu2 %v1231_v55  ;;  %v1683_v25 = vld [vmem:[%s2516_s1 + $0x2f4] sm:$0xf0]  ;;  %v1518_v27 = vld [vmem:[%s2516_s1 + $0x370] sm:$0xf]  ;;  %v1207_v31 = vor.u32 %v1621_v21, %v1206_v20  ;;  %v1382_v36 = vld [vmem:[%s2516_s1 + $0x260] sm:$0xf] }
  0x17   :  { %769 = vmatpush.bf16.msra.mxu3 %v1303_v1  ;;  %v1699_v28 = vld [vmem:[%s2516_s1 + $0x374] sm:$0xf0]  ;;  %v1278_v32 = vld [vmem:[%s2516_s1 + $0x190] sm:$0xf]  ;;  %v1455_v35 = vor.u32 %v1683_v25, %v1454_v24  ;;  %v1665_v37 = vld [vmem:[%s2516_s1 + $0x264] sm:$0xf0] }
  0x18   :  { %732 = vmatpush.bf16.msra.mxu0 %v1095_v62  ;;  %v1639_v33 = vld [vmem:[%s2516_s1 + $0x194] sm:$0xf0]  ;;  %v1519_v38 = vor.u32 %v1699_v28, %v1518_v27  ;;  %v1446_v39 = vld [vmem:[%s2516_s1 + $0x2e0] sm:$0xf]  ;;  %v1681_v40 = vld [vmem:[%s2516_s1 + $0x2e4] sm:$0xf0]  ;;  %v1383_v46 = vor.u32 %v1665_v37, %v1382_v36 }
  0x19   :  { %745 = vmatpush.bf16.msra.mxu1 %v1159_v2  ;;  %v21_v41 = vld [vmem:[%s2517_s0 + $0x8] sm:$0xff]  ;;  %v1510_v42 = vld [vmem:[%s2516_s1 + $0x360] sm:$0xf]  ;;  %v1279_v44 = vor.u32 %v1639_v33, %v1278_v32  ;;  %v1447_v50 = vor.u32 %v1681_v40, %v1446_v39  ;;  %v1374_v51 = vld [vmem:[%s2516_s1 + $0x250] sm:$0xf] }
  0x1a   :  { %758 = vmatpush.bf16.msra.mxu2 %v1223_v3  ;;  %v1697_v43 = vld [vmem:[%s2516_s1 + $0x364] sm:$0xf0]  ;;  %v148_v45 = vunpack.c.l.b16 %v21_v41  ;;  %v1270_v47 = vld [vmem:[%s2516_s1 + $0x180] sm:$0xf]  ;;  %v1602_v52 = vld [vmem:[%s2516_s1 + $0x74] sm:$0xf]  ;;  %v149_v61 = vunpack.c.h.b16 %v21_v41 }
  0x1b   :  { %770 = vmatpush.bf16.msra.mxu3 %v1295_v14  ;;  %v1637_v48 = vld [vmem:[%s2516_s1 + $0x184] sm:$0xf0]  ;;  %v20_v49 = vld [vmem:[%s2517_s0] sm:$0xff]  ;;  %v1136_v53 = vld [vmem:[%s2516_s1 + $0x78] sm:$0xf0]  ;;  %v1511_v57 = vor.u32 %v1697_v43, %v1510_v42 }
  0x1c   :  { %733 = vmatpush.bf16.msra.mxu0 %v1087_v10  ;;  %v1990_v54 = vpack.c.b16 %v148_v45, %v148_v45  ;;  %v146_v55 = vunpack.c.l.b16 %v20_v49  ;;  %v147_v56 = vunpack.c.h.b16 %v20_v49  ;;  %v1663_v58 = vld [vmem:[%s2516_s1 + $0x254] sm:$0xf0]  ;;  %v1438_v59 = vld [vmem:[%s2516_s1 + $0x2d0] sm:$0xf]  ;;  %v1271_v0 = vor.u32 %v1637_v48, %v1270_v47  ;;  %v1366_v6 = vld [vmem:[%s2516_s1 + $0x240] sm:$0xf] }
  0x1d   :  { %746 = vmatpush.bf16.msra.mxu1 %v1151_v15  ;;  %v1679_v60 = vld [vmem:[%s2516_s1 + $0x2d4] sm:$0xf0]  ;;  %v1502_v62 = vld [vmem:[%s2516_s1 + $0x350] sm:$0xf]  ;;  %v1139_v3 = vor.u32 %v1602_v52, %v1136_v53  ;;  %v1375_v4 = vor.u32 %v1663_v58, %v1374_v51  ;;  %v1600_v7 = vld [vmem:[%s2516_s1 + $0x64] sm:$0xf]  ;;  %v2031_v13 = vpack.c.b16 %v149_v61, %v149_v61 }
  0x1e   :  { %759 = vmatpush.bf16.msra.mxu2 %v1215_v16  ;;  %v1695_v63 = vld [vmem:[%s2516_s1 + $0x354] sm:$0xf0]  ;;  %v2008_v1 = vpack.c.b16 %v146_v55, %v146_v55  ;;  %v2010_v2 = vpack.c.b16 %v147_v56, %v147_v56  ;;  %v1439_v5 = vor.u32 %v1679_v60, %v1438_v59  ;;  %v1128_v8 = vld [vmem:[%s2516_s1 + $0x68] sm:$0xf0]  ;;  %v1661_v10 = vld [vmem:[%s2516_s1 + $0x244] sm:$0xf0] }
  0x1f   :  { %771 = vmatpush.bf16.msra.mxu3 %v1287_v29  ;;  %v1503_v9 = vor.u32 %v1695_v63, %v1502_v62  ;;  %v1430_v11 = vld [vmem:[%s2516_s1 + $0x2c0] sm:$0xf]  ;;  %v1677_v12 = vld [vmem:[%s2516_s1 + $0x2c4] sm:$0xf0]  ;;  %v1131_v16 = vor.u32 %v1600_v7, %v1128_v8  ;;  %v1367_v17 = vor.u32 %v1661_v10, %v1366_v6  ;;  %v1358_v19 = vld [vmem:[%s2516_s1 + $0x230] sm:$0xf] }
  0x20   :  { %734 = vmatpush.bf16.msra.mxu0 %v1079_v26  ;;  %v1494_v14 = vld [vmem:[%s2516_s1 + $0x340] sm:$0xf]  ;;  %v1693_v15 = vld [vmem:[%s2516_s1 + $0x344] sm:$0xf0]  ;;  %v1431_v18 = vor.u32 %v1677_v12, %v1430_v11  ;;  %v1598_v20 = vld [vmem:[%s2516_s1 + $0x54] sm:$0xf] }
  0x21   :  { %747 = vmatpush.bf16.msra.mxu1 %v1143_v30  ;;  %v1120_v21 = vld [vmem:[%s2516_s1 + $0x58] sm:$0xf0]  ;;  %v1495_v22 = vor.u32 %v1693_v15, %v1494_v14  ;;  %v1659_v23 = vld [vmem:[%s2516_s1 + $0x234] sm:$0xf0]  ;;  %v1422_v24 = vld [vmem:[%s2516_s1 + $0x2b0] sm:$0xf] }
  0x22   :  { %760 = vmatpush.bf16.msra.mxu2 %v1207_v31  ;;  %v1675_v25 = vld [vmem:[%s2516_s1 + $0x2b4] sm:$0xf0]  ;;  %v1486_v26 = vld [vmem:[%s2516_s1 + $0x330] sm:$0xf]  ;;  %v1123_v28 = vor.u32 %v1598_v20, %v1120_v21  ;;  %v1359_v29 = vor.u32 %v1659_v23, %v1358_v19  ;;  %v1350_v31 = vld [vmem:[%s2516_s1 + $0x220] sm:$0xf] }
  0x23   :  { %772 = vmatpush.bf16.msra.mxu3 %v1279_v44  ;;  %735 = vmatmul.bf16.vlgmr.msra.gmra.mxu0 %v2008_v1  ;;  %v1691_v27 = vld [vmem:[%s2516_s1 + $0x334] sm:$0xf0]  ;;  %v1423_v30 = vor.u32 %v1675_v25, %v1422_v24  ;;  %v1596_v32 = vld [vmem:[%s2516_s1 + $0x44] sm:$0xf]  ;;  %v1112_v33 = vld [vmem:[%s2516_s1 + $0x48] sm:$0xf0] }
  0x24   :  { %779 = vmatpush.bf16.msrb.mxu0 %v1391_v34  ;;  %748 = vmatmul.bf16.vlgmr.msra.gmra.mxu1 %v2010_v2  ;;  %v1487_v34 = vor.u32 %v1691_v27, %v1486_v26  ;;  %v1414_v36 = vld [vmem:[%s2516_s1 + $0x2a0] sm:$0xf]  ;;  %v1673_v37 = vld [vmem:[%s2516_s1 + $0x2a4] sm:$0xf0]  ;;  %v1115_v40 = vor.u32 %v1596_v32, %v1112_v33  ;;  %v1342_v43 = vld [vmem:[%s2516_s1 + $0x210] sm:$0xf] }
  0x25   :  { %792 = vmatpush.bf16.msrb.mxu1 %v1455_v35  ;;  %761 = vmatmul.bf16.vlgmr.msra.gmra.mxu2 %v1990_v54  ;;  %v1657_v35 = vld [vmem:[%s2516_s1 + $0x224] sm:$0xf0]  ;;  %v1415_v42 = vor.u32 %v1673_v37, %v1414_v36  ;;  %v1594_v44 = vld [vmem:[%s2516_s1 + $0x34] sm:$0xf]  ;;  %v1104_v45 = vld [vmem:[%s2516_s1 + $0x38] sm:$0xf0] }
  0x26   :  { %805 = vmatpush.bf16.msrb.mxu2 %v1519_v38  ;;  %v1478_v38 = vld [vmem:[%s2516_s1 + $0x320] sm:$0xf]  ;;  %v1689_v39 = vld [vmem:[%s2516_s1 + $0x324] sm:$0xf0]  ;;  %v1351_v41 = vor.u32 %v1657_v35, %v1350_v31  ;;  %v1655_v47 = vld [vmem:[%s2516_s1 + $0x214] sm:$0xf0] }
  0x27   :  { %773 = vmatpush.bf16.msra.mxu3 %v1271_v0  ;;  %v1406_v48 = vld [vmem:[%s2516_s1 + $0x290] sm:$0xf]  ;;  %v1671_v49 = vld [vmem:[%s2516_s1 + $0x294] sm:$0xf0]  ;;  %v1334_v52 = vld [vmem:[%s2516_s1 + $0x200] sm:$0xf]  ;;  %v1343_v58 = vor.u32 %v1655_v47, %v1342_v43 }
  0x28   :  { %780 = vmatpush.bf16.msrb.mxu0 %v1383_v46  ;;  %v1479_v46 = vor.u32 %v1689_v39, %v1478_v38  ;;  %v1687_v51 = vld [vmem:[%s2516_s1 + $0x314] sm:$0xf0]  ;;  %v1653_v53 = vld [vmem:[%s2516_s1 + $0x204] sm:$0xf0]  ;;  %v1398_v55 = vld [vmem:[%s2516_s1 + $0x280] sm:$0xf]  ;;  %v1407_v59 = vor.u32 %v1671_v49, %v1406_v48 }
  0x29   :  { %793 = vmatpush.bf16.msrb.mxu1 %v1447_v50  ;;  %v1470_v50 = vld [vmem:[%s2516_s1 + $0x310] sm:$0xf]  ;;  %v1669_v56 = vld [vmem:[%s2516_s1 + $0x284] sm:$0xf0]  ;;  %v1592_v61 = vld [vmem:[%s2516_s1 + $0x24] sm:$0xf]  ;;  %v1335_v15 = vor.u32 %v1653_v53, %v1334_v52 }
  0x2a   :  { %806 = vmatpush.bf16.msrb.mxu2 %v1511_v57  ;;  %774 = vmatmul.bf16.vlgmr.msra.gmra.mxu3 %v2031_v13  ;;  %v1107_v57 = vor.u32 %v1594_v44, %v1104_v45  ;;  %v22_v60 = vld [vmem:[%s2517_s0 + $0x10] sm:$0xff]  ;;  %v1096_v62 = vld [vmem:[%s2516_s1 + $0x28] sm:$0xf0]  ;;  %v1471_v63 = vor.u32 %v1687_v51, %v1470_v50  ;;  %v1462_v0 = vld [vmem:[%s2516_s1 + $0x300] sm:$0xf] }
  0x2b   :  { %818 = vmatpush.bf16.msrb.mxu3 %v1139_v3  ;;  %v1685_v3 = vld [vmem:[%s2516_s1 + $0x304] sm:$0xf0]  ;;  %v1200_v6 = vld [vmem:[%s2516_s1 + $0xf8] sm:$0xf0]  ;;  %v1634_v7 = vld [vmem:[%s2516_s1 + $0x174] sm:$0xf]  ;;  %v1099_v10 = vor.u32 %v1592_v61, %v1096_v62  ;;  %v151_v11 = vunpack.c.h.b16 %v22_v60 }
  0x2c   :  { %781 = vmatpush.bf16.msrb.mxu0 %v1375_v4  ;;  %v23_v4 = vld [vmem:[%s2517_s0 + $0x18] sm:$0xf]  ;;  %v1264_v8 = vld [vmem:[%s2516_s1 + $0x178] sm:$0xf0]  ;;  %v1650_v12 = vld [vmem:[%s2516_s1 + $0x1f4] sm:$0xf] }
  0x2d   :  { %794 = vmatpush.bf16.msrb.mxu1 %v1439_v5  ;;  %v1618_v5 = vld [vmem:[%s2516_s1 + $0xf4] sm:$0xf]  ;;  %v1328_v14 = vld [vmem:[%s2516_s1 + $0x1f8] sm:$0xf0]  ;;  %v1616_v23 = vld [vmem:[%s2516_s1 + $0xe4] sm:$0xf] }
  0x2e   :  { %807 = vmatpush.bf16.msrb.mxu2 %v1503_v9  ;;  %v150_v9 = vunpack.c.l.b16 %v22_v60  ;;  %v1203_v19 = vor.u32 %v1618_v5, %v1200_v6  ;;  %v1590_v20 = vld [vmem:[%s2516_s1 + $0x14] sm:$0xf]  ;;  %v1088_v21 = vld [vmem:[%s2516_s1 + $0x18] sm:$0xf0]  ;;  %v1192_v24 = vld [vmem:[%s2516_s1 + $0xe8] sm:$0xf0]  ;;  %v1331_v26 = vor.u32 %v1650_v12, %v1328_v14 }
  0x2f   :  { %819 = vmatpush.bf16.msrb.mxu3 %v1131_v16  ;;  %v1399_v16 = vor.u32 %v1669_v56, %v1398_v55  ;;  %v1632_v25 = vld [vmem:[%s2516_s1 + $0x164] sm:$0xf]  ;;  %v1320_v31 = vld [vmem:[%s2516_s1 + $0x1e8] sm:$0xf0]  ;;  %v1091_v33 = vor.u32 %v1590_v20, %v1088_v21  ;;  %v1195_v35 = vor.u32 %v1616_v23, %v1192_v24  ;;  %v1184_v36 = vld [vmem:[%s2516_s1 + $0xd8] sm:$0xf0] }
  0x30   :  { %782 = vmatpush.bf16.msrb.mxu0 %v1367_v17  ;;  %v152_v17 = vunpack.c.l.b16 %v23_v4  ;;  %v2176_v27 = vpack.c.b16 %v150_v9, %v150_v9  ;;  %v1588_v37 = vld [vmem:[%s2516_s1 + $0x4] sm:$0xf]  ;;  %v1080_v38 = vld [vmem:[%s2516_s1 + $0x8] sm:$0xf0]  ;;  %v1248_v44 = vld [vmem:[%s2516_s1 + $0x158] sm:$0xf0] }
  0x31   :  { %795 = vmatpush.bf16.msrb.mxu1 %v1431_v18  ;;  %v1463_v18 = vor.u32 %v1685_v3, %v1462_v0  ;;  %v1646_v45 = vld [vmem:[%s2516_s1 + $0x1d4] sm:$0xf]  ;;  %v1083_v47 = vor.u32 %v1588_v37, %v1080_v38  ;;  %v1612_v49 = vld [vmem:[%s2516_s1 + $0xc4] sm:$0xf]  ;;  %v1176_v50 = vld [vmem:[%s2516_s1 + $0xc8] sm:$0xf0] }
  0x32   :  { %808 = vmatpush.bf16.msrb.mxu2 %v1495_v22  ;;  %v1267_v22 = vor.u32 %v1634_v7, %v1264_v8  ;;  %v2189_v32 = vpack.c.b16 %v152_v17, %v152_v17  ;;  %v1628_v53 = vld [vmem:[%s2516_s1 + $0x144] sm:$0xf]  ;;  %v1384_v56 = vld [vmem:[%s2516_s1 + $0x268] sm:$0xf0]  ;;  %v1179_v61 = vor.u32 %v1612_v49, %v1176_v50  ;;  %v1610_v62 = vld [vmem:[%s2516_s1 + $0xb4] sm:$0xf] }
  0x33   :  { %820 = vmatpush.bf16.msrb.mxu3 %v1123_v28  ;;  %v1256_v28 = vld [vmem:[%s2516_s1 + $0x168] sm:$0xf0]  ;;  %v1664_v55 = vld [vmem:[%s2516_s1 + $0x264] sm:$0xf]  ;;  %v1626_v4 = vld [vmem:[%s2516_s1 + $0x134] sm:$0xf] }
  0x34   :  { %783 = vmatpush.bf16.msrb.mxu0 %v1359_v29  ;;  %v2181_v29 = vpack.c.b16 %v151_v11, %v151_v11  ;;  %v1259_v39 = vor.u32 %v1632_v25, %v1256_v28  ;;  %v1304_v60 = vld [vmem:[%s2516_s1 + $0x1c8] sm:$0xf0]  ;;  %v1387_v0 = vor.u32 %v1664_v55, %v1384_v56  ;;  %v1662_v5 = vld [vmem:[%s2516_s1 + $0x254] sm:$0xf]  ;;  %v1376_v6 = vld [vmem:[%s2516_s1 + $0x258] sm:$0xf0] }
  0x35   :  { %796 = vmatpush.bf16.msrb.mxu1 %v1423_v30  ;;  %v1648_v30 = vld [vmem:[%s2516_s1 + $0x1e4] sm:$0xf]  ;;  %v1232_v8 = vld [vmem:[%s2516_s1 + $0x138] sm:$0xf0]  ;;  %v1642_v9 = vld [vmem:[%s2516_s1 + $0x1b4] sm:$0xf] }
  0x36   :  { %809 = vmatpush.bf16.msrb.mxu2 %v1487_v34  ;;  %v1614_v34 = vld [vmem:[%s2516_s1 + $0xd4] sm:$0xf]  ;;  %v1323_v43 = vor.u32 %v1648_v30, %v1320_v31  ;;  %v1608_v12 = vld [vmem:[%s2516_s1 + $0xa4] sm:$0xf]  ;;  %v1160_v14 = vld [vmem:[%s2516_s1 + $0xa8] sm:$0xf0] }
  0x37   :  { %821 = vmatpush.bf16.msrb.mxu3 %v1115_v40  ;;  %v1630_v40 = vld [vmem:[%s2516_s1 + $0x154] sm:$0xf]  ;;  %v1187_v48 = vor.u32 %v1614_v34, %v1184_v36  ;;  %v1624_v17 = vld [vmem:[%s2516_s1 + $0x124] sm:$0xf]  ;;  %v1224_v20 = vld [vmem:[%s2516_s1 + $0x128] sm:$0xf0]  ;;  %v1163_v23 = vor.u32 %v1608_v12, %v1160_v14 }
  0x38   :  { %784 = vmatpush.bf16.msrb.mxu0 %v1351_v41  ;;  %v1666_v41 = vld [vmem:[%s2516_s1 + $0x274] sm:$0xf]  ;;  %v1251_v52 = vor.u32 %v1630_v40, %v1248_v44  ;;  %v1640_v21 = vld [vmem:[%s2516_s1 + $0x1a4] sm:$0xf]  ;;  %v1152_v25 = vld [vmem:[%s2516_s1 + $0x98] sm:$0xf0]  ;;  %v1227_v28 = vor.u32 %v1624_v17, %v1224_v20 }
  0x39   :  { %797 = vmatpush.bf16.msrb.mxu1 %v1415_v42  ;;  %v1392_v42 = vld [vmem:[%s2516_s1 + $0x278] sm:$0xf0]  ;;  %v1606_v24 = vld [vmem:[%s2516_s1 + $0x94] sm:$0xf]  ;;  %v1144_v40 = vld [vmem:[%s2516_s1 + $0x88] sm:$0xf0] }
  0x3a   :  { %810 = vmatpush.bf16.msrb.mxu2 %v1479_v46  ;;  %v1312_v46 = vld [vmem:[%s2516_s1 + $0x1d8] sm:$0xf0]  ;;  %v1395_v51 = vor.u32 %v1666_v41, %v1392_v42  ;;  %v1622_v30 = vld [vmem:[%s2516_s1 + $0x114] sm:$0xf]  ;;  %v1155_v38 = vor.u32 %v1606_v24, %v1152_v25  ;;  %v1620_v41 = vld [vmem:[%s2516_s1 + $0x104] sm:$0xf] }
  0x3b   :  { %822 = vmatpush.bf16.msrb.mxu3 %v1107_v57  ;;  %v1315_v57 = vor.u32 %v1646_v45, %v1312_v46  ;;  %v1658_v31 = vld [vmem:[%s2516_s1 + $0x234] sm:$0xf]  ;;  %v1280_v37 = vld [vmem:[%s2516_s1 + $0x198] sm:$0xf0]  ;;  %v1208_v44 = vld [vmem:[%s2516_s1 + $0x108] sm:$0xf0] }
  0x3c   :  { %785 = vmatpush.bf16.msrb.mxu0 %v1343_v58  ;;  %v1240_v58 = vld [vmem:[%s2516_s1 + $0x148] sm:$0xf0]  ;;  %v1638_v36 = vld [vmem:[%s2516_s1 + $0x194] sm:$0xf]  ;;  %v1656_v45 = vld [vmem:[%s2516_s1 + $0x224] sm:$0xf] }
  0x3d   :  { %798 = vmatpush.bf16.msrb.mxu1 %v1407_v59  ;;  %v1644_v59 = vld [vmem:[%s2516_s1 + $0x1c4] sm:$0xf]  ;;  %v1243_v3 = vor.u32 %v1628_v53, %v1240_v58  ;;  %v1352_v46 = vld [vmem:[%s2516_s1 + $0x228] sm:$0xf0]  ;;  %v1456_v49 = vld [vmem:[%s2516_s1 + $0x2f8] sm:$0xf0] }
  0x3e   :  { %811 = vmatpush.bf16.msrb.mxu2 %v1471_v63  ;;  %v1168_v63 = vld [vmem:[%s2516_s1 + $0xb8] sm:$0xf0]  ;;  %v1307_v7 = vor.u32 %v1644_v59, %v1304_v60  ;;  %v1698_v50 = vld [vmem:[%s2516_s1 + $0x374] sm:$0xf]  ;;  %v1272_v53 = vld [vmem:[%s2516_s1 + $0x188] sm:$0xf0]  ;;  %v1355_v56 = vor.u32 %v1656_v45, %v1352_v46 }
  0x3f   :  { %823 = vmatpush.bf16.msrb.mxu3 %v1099_v10  ;;  %v1296_v10 = vld [vmem:[%s2516_s1 + $0x1b8] sm:$0xf0]  ;;  %v1171_v11 = vor.u32 %v1610_v62, %v1168_v63  ;;  %v1654_v59 = vld [vmem:[%s2516_s1 + $0x214] sm:$0xf]  ;;  %v1680_v62 = vld [vmem:[%s2516_s1 + $0x2e4] sm:$0xf] }
  0x40   :  { %786 = vmatpush.bf16.msrb.mxu0 %v1335_v15  ;;  %v1379_v15 = vor.u32 %v1662_v5, %v1376_v6  ;;  %v1344_v60 = vld [vmem:[%s2516_s1 + $0x218] sm:$0xf0]  ;;  %v1448_v63 = vld [vmem:[%s2516_s1 + $0x2e8] sm:$0xf0]  ;;  %v1694_v14 = vld [vmem:[%s2516_s1 + $0x354] sm:$0xf] }
  0x41   :  { %799 = vmatpush.bf16.msrb.mxu1 %v1399_v16  ;;  %v1235_v16 = vor.u32 %v1626_v4, %v1232_v8  ;;  %v1512_v4 = vld [vmem:[%s2516_s1 + $0x368] sm:$0xf0]  ;;  %v1347_v5 = vor.u32 %v1654_v59, %v1344_v60  ;;  %v1451_v6 = vor.u32 %v1680_v62, %v1448_v63  ;;  %v1440_v12 = vld [vmem:[%s2516_s1 + $0x2d8] sm:$0xf0] }
  0x42   :  { %812 = vmatpush.bf16.msrb.mxu2 %v1463_v18  ;;  %v1368_v18 = vld [vmem:[%s2516_s1 + $0x248] sm:$0xf0]  ;;  %v1488_v24 = vld [vmem:[%s2516_s1 + $0x338] sm:$0xf0] }
  0x43   :  { %787 = vmatmul.bf16.vlgmr.msrb.gmra.mxu0 %v2176_v27  ;;  %824 = vmatpush.bf16.msrb.mxu3 %v1091_v33  ;;  %v1360_v33 = vld [vmem:[%s2516_s1 + $0x238] sm:$0xf0]  ;;  %v1336_v8 = vld [vmem:[%s2516_s1 + $0x208] sm:$0xf0] }
  0x44   :  { %831 = vmatpush.bf16.msra.mxu0 %v1203_v19  ;;  %800 = vmatmul.bf16.vlgmr.msrb.gmra.mxu1 %v2181_v29  ;;  %v1299_v19 = vor.u32 %v1642_v9, %v1296_v10  ;;  %v1363_v42 = vor.u32 %v1658_v31, %v1360_v33  ;;  %v1707_v9 = vld [vmem:[%s2518_s3 + $0x38] sm:$0xff]  ;;  %v1480_v31 = vld [vmem:[%s2516_s1 + $0x328] sm:$0xf0] }
  0x45   :  { %844 = vmatpush.bf16.msra.mxu1 %v1267_v22  ;;  %813 = vmatmul.bf16.vlgmr.msrb.gmra.mxu2 %v2189_v32  ;;  %v1288_v22 = vld [vmem:[%s2516_s1 + $0x1a8] sm:$0xf0] }
  0x46   :  { %857 = vmatpush.bf16.msra.mxu2 %v1331_v26  ;;  %v1291_v34 = vor.u32 %v1640_v21, %v1288_v22  ;;  %v1674_v21 = vld [vmem:[%s2516_s1 + $0x2b4] sm:$0xf]  ;;  %v1424_v22 = vld [vmem:[%s2516_s1 + $0x2b8] sm:$0xf0] }
  0x47   :  { %825 = vmatpush.bf16.msrb.mxu3 %v1083_v47  ;;  %v1283_v47 = vor.u32 %v1638_v36, %v1280_v37  ;;  %v1427_v25 = vor.u32 %v1674_v21, %v1424_v22  ;;  %v1408_v36 = vld [vmem:[%s2516_s1 + $0x298] sm:$0xf0]  ;;  %v1686_v37 = vld [vmem:[%s2516_s1 + $0x314] sm:$0xf]  ;;  %v1709_v21 = vld [vmem:[%s2518_s3 + $0x48] sm:$0xff] }
  0x48   :  { %832 = vmatpush.bf16.msra.mxu0 %v1195_v35  ;;  %v1216_v35 = vld [vmem:[%s2516_s1 + $0x118] sm:$0xf0] }
  0x49   :  { %845 = vmatpush.bf16.msra.mxu1 %v1259_v39  ;;  %v1604_v39 = vld [vmem:[%s2516_s1 + $0x84] sm:$0xf] }
  0x4a   :  { %858 = vmatpush.bf16.msra.mxu2 %v1323_v43  ;;  %826 = vmatmul.bf16.vlgmr.msrb.gmra.mxu3 %v2008_v1  ;;  %v1660_v1 = vld [vmem:[%s2516_s1 + $0x244] sm:$0xf]  ;;  %v1219_v43 = vor.u32 %v1622_v30, %v1216_v35  ;;  %v1147_v55 = vor.u32 %v1604_v39, %v1144_v40  ;;  %v1670_v35 = vld [vmem:[%s2516_s1 + $0x294] sm:$0xf] }
  0x4b   :  { %870 = vmatpush.bf16.msra.mxu3 %v1395_v51  ;;  %v1371_v26 = vor.u32 %v1660_v1, %v1368_v18  ;;  %v1520_v51 = vld [vmem:[%s2516_s1 + $0x378] sm:$0xf0]  ;;  %v1432_v18 = vld [vmem:[%s2516_s1 + $0x2c8] sm:$0xf0]  ;;  %v1688_v30 = vld [vmem:[%s2516_s1 + $0x324] sm:$0xf]  ;;  %v1411_v39 = vor.u32 %v1670_v35, %v1408_v36 }
  0x4c   :  { %833 = vmatpush.bf16.msra.mxu0 %v1187_v48  ;;  %v1682_v48 = vld [vmem:[%s2516_s1 + $0x2f4] sm:$0xf] }
  0x4d   :  { %846 = vmatpush.bf16.msra.mxu1 %v1251_v52  ;;  %v1636_v52 = vld [vmem:[%s2516_s1 + $0x184] sm:$0xf]  ;;  %v1459_v58 = vor.u32 %v1682_v48, %v1456_v49  ;;  %v1705_v48 = vld [vmem:[%s2518_s3 + $0x28] sm:$0xff] }
  0x4e   :  { %859 = vmatpush.bf16.msra.mxu2 %v1315_v57  ;;  %v1211_v57 = vor.u32 %v1620_v41, %v1208_v44  ;;  %v1668_v41 = vld [vmem:[%s2516_s1 + $0x284] sm:$0xf]  ;;  %v1464_v44 = vld [vmem:[%s2516_s1 + $0x308] sm:$0xf0] }
  0x4f   :  { %871 = vmatpush.bf16.msra.mxu3 %v1387_v0  ;;  %v1275_v0 = vor.u32 %v1636_v52, %v1272_v53  ;;  %v1704_v49 = vld [vmem:[%s2518_s3 + $0x20] sm:$0xff] }
  0x50   :  { %834 = vmatpush.bf16.msra.mxu0 %v1179_v61  ;;  %v1523_v61 = vor.u32 %v1698_v50, %v1520_v51  ;;  %v1701_v50 = vld [vmem:[%s2518_s3 + $0x8] sm:$0xff] }
  0x51   :  { %847 = vmatpush.bf16.msra.mxu1 %v1243_v3  ;;  %v1696_v3 = vld [vmem:[%s2516_s1 + $0x364] sm:$0xf] }
  0x52   :  { %860 = vmatpush.bf16.msra.mxu2 %v1307_v7  ;;  %v1652_v7 = vld [vmem:[%s2516_s1 + $0x204] sm:$0xf]  ;;  %v1515_v10 = vor.u32 %v1696_v3, %v1512_v4 }
  0x53   :  { %872 = vmatpush.bf16.msra.mxu3 %v1379_v15  ;;  %v1504_v15 = vld [vmem:[%s2516_s1 + $0x358] sm:$0xf0] }
  0x54   :  { %835 = vmatpush.bf16.msra.mxu0 %v1171_v11  ;;  %v1678_v11 = vld [vmem:[%s2516_s1 + $0x2d4] sm:$0xf]  ;;  %v1507_v1 = vor.u32 %v1694_v14, %v1504_v15 }
  0x55   :  { %848 = vmatpush.bf16.msra.mxu1 %v1235_v16  ;;  %v1339_v16 = vor.u32 %v1652_v7, %v1336_v8  ;;  %v1443_v17 = vor.u32 %v1678_v11, %v1440_v12  ;;  %v1715_v7 = vld [vmem:[%s2518_s3 + $0x78] sm:$0xff]  ;;  %v1713_v11 = vld [vmem:[%s2518_s3 + $0x68] sm:$0xff] }
  0x56   :  { %861 = vmatpush.bf16.msra.mxu2 %v1299_v19  ;;  %v1692_v19 = vld [vmem:[%s2516_s1 + $0x344] sm:$0xf] }
  0x57   :  { %873 = vmatpush.bf16.msra.mxu3 %v1371_v26 }
  0x58   :  { %836 = vmatpush.bf16.msra.mxu0 %v1163_v23  ;;  %v1690_v23 = vld [vmem:[%s2516_s1 + $0x334] sm:$0xf] }
  0x59   :  { %849 = vmatpush.bf16.msra.mxu1 %v1227_v28  ;;  %v1491_v26 = vor.u32 %v1690_v23, %v1488_v24  ;;  %v1672_v28 = vld [vmem:[%s2516_s1 + $0x2a4] sm:$0xf] }
  0x5a   :  { %862 = vmatpush.bf16.msra.mxu2 %v1291_v34  ;;  %v1483_v34 = vor.u32 %v1688_v30, %v1480_v31  ;;  %v1708_v24 = vld [vmem:[%s2518_s3 + $0x40] sm:$0xff] }
  0x5b   :  { %874 = vmatpush.bf16.msra.mxu3 %v1363_v42  ;;  %v1400_v42 = vld [vmem:[%s2516_s1 + $0x288] sm:$0xf0] }
  0x5c   :  { %837 = vmatpush.bf16.msra.mxu0 %v1155_v38  ;;  %v1472_v38 = vld [vmem:[%s2516_s1 + $0x318] sm:$0xf0]  ;;  %v1403_v45 = vor.u32 %v1668_v41, %v1400_v42 }
  0x5d   :  { %850 = vmatpush.bf16.msra.mxu1 %v1219_v43  ;;  %v1475_v40 = vor.u32 %v1686_v37, %v1472_v38  ;;  %v1684_v43 = vld [vmem:[%s2516_s1 + $0x304] sm:$0xf] }
  0x5e   :  { %863 = vmatpush.bf16.msra.mxu2 %v1283_v47  ;;  %v1467_v46 = vor.u32 %v1684_v43, %v1464_v44  ;;  %v1706_v47 = vld [vmem:[%s2518_s3 + $0x30] sm:$0xff] }
  0x5f   :  { %875 = vmatpush.bf16.msra.mxu3 %v1355_v56  ;;  %v136_v56 = vld [vmem:[%s2520_s2] sm:$0x3] }
  0x60   :  { %838 = vmatpush.bf16.msra.mxu0 %v1147_v55  ;;  %v1700_v55 = vld [vmem:[%s2518_s3] sm:$0xff] }
  0x61   :  { %851 = vmatpush.bf16.msra.mxu1 %v1211_v57  ;;  %v138_v57 = vperm.slane %v136_v56, 0 }
  0x62   :  { %864 = vmatpush.bf16.msra.mxu2 %v1275_v0 }
  0x63   :  { %839 = vmatmul.bf16.vlgmr.msra.gmra.mxu0 %v2010_v2  ;;  %876 = vmatpush.bf16.msra.mxu3 %v1347_v5  ;;  %v1676_v2 = vld [vmem:[%s2516_s1 + $0x2c4] sm:$0xf] }
  0x64   :  { %883 = vmatpush.bf16.msrb.mxu0 %v1459_v58  ;;  %852 = vmatmul.bf16.vlgmr.msra.gmra.mxu1 %v1990_v54  ;;  %v1496_v54 = vld [vmem:[%s2516_s1 + $0x348] sm:$0xf0] }
  0x65   :  { %896 = vmatpush.bf16.msrb.mxu1 %v1523_v61  ;;  %865 = vmatmul.bf16.vlgmr.msra.gmra.mxu2 %v2031_v13  ;;  %v1435_v13 = vor.u32 %v1676_v2, %v1432_v18  ;;  %v1499_v20 = vor.u32 %v1692_v19, %v1496_v54  ;;  %v1712_v2 = vld [vmem:[%s2518_s3 + $0x60] sm:$0xff]  ;;  %v1711_v19 = vld [vmem:[%s2518_s3 + $0x58] sm:$0xff] }
  0x66   :  { %1045 = vmatpush.bf16.msrb.mxu2 %v1707_v9  ;;  %v1714_v9 = vld [vmem:[%s2518_s3 + $0x70] sm:$0xff] }
  0x67   :  { %877 = vmatpush.bf16.msra.mxu3 %v1339_v16 }
  0x68   :  { %884 = vmatpush.bf16.msrb.mxu0 %v1451_v6 }
  0x69   :  { %897 = vmatpush.bf16.msrb.mxu1 %v1515_v10 }
  0x6a   :  { %878 = vmatmul.bf16.vlgmr.msra.gmra.mxu3 %v2176_v27  ;;  %v1416_v27 = vld [vmem:[%s2516_s1 + $0x2a8] sm:$0xf0]  ;;  %1046 = vmatpush.bf16.msrb.mxu2 %v1706_v47 }
  0x6b   :  { %v1419_v33 = vor.u32 %v1672_v28, %v1416_v27  ;;  %1058 = vmatpush.bf16.msrb.mxu3 %v1715_v7 }
  0x6c   :  { %885 = vmatpush.bf16.msrb.mxu0 %v1443_v17 }
  0x6d   :  { %898 = vmatpush.bf16.msrb.mxu1 %v1507_v1 }
  0x6e   :  { %1047 = vmatpush.bf16.msrb.mxu2 %v1705_v48 }
  0x6f   :  { %1059 = vmatpush.bf16.msrb.mxu3 %v1714_v9 }
  0x70   :  { %886 = vmatpush.bf16.msrb.mxu0 %v1435_v13  ;;  %v1710_v13 = vld [vmem:[%s2518_s3 + $0x50] sm:$0xff] }
  0x71   :  { %899 = vmatpush.bf16.msrb.mxu1 %v1499_v20 }
  0x72   :  { %1048 = vmatpush.bf16.msrb.mxu2 %v1704_v49  ;;  %v1716_v49 = vld [vmem:[%s2519_s4] ss:$0 sm:$0xff] }
  0x73   :  { %1060 = vmatpush.bf16.msrb.mxu3 %v1713_v11 }
  0x74   :  { %887 = vmatpush.bf16.msrb.mxu0 %v1427_v25  ;;  %v139_v25 = vperm.slane %v136_v56, 1 }
  0x75   :  { %900 = vmatpush.bf16.msrb.mxu1 %v1491_v26 }
  0x77   :  { %1061 = vmatpush.bf16.msrb.mxu3 %v1712_v2 }
  0x78   :  { %888 = vmatpush.bf16.msrb.mxu0 %v1419_v33 }
  0x79   :  { %901 = vmatpush.bf16.msrb.mxu1 %v1483_v34 }
  0x7b   :  { %1062 = vmatpush.bf16.msrb.mxu3 %v1711_v19 }
  0x7c   :  { %889 = vmatpush.bf16.msrb.mxu0 %v1411_v39 }
  0x7d   :  { %902 = vmatpush.bf16.msrb.mxu1 %v1475_v40 }
  0x7f   :  { %1063 = vmatpush.bf16.msrb.mxu3 %v1710_v13 }
  0x80   :  { %890 = vmatpush.bf16.msrb.mxu0 %v1403_v45 }
  0x81   :  { %903 = vmatpush.bf16.msrb.mxu1 %v1467_v46 }
  0x83   :  { %891 = vmatmul.bf16.vlgmr.msrb.gmra.mxu0 %v2181_v29  ;;  %v1703_v29 = vld [vmem:[%s2518_s3 + $0x18] sm:$0xff]  ;;  %1064 = vmatpush.bf16.msrb.mxu3 %v1709_v21 }
  0x84   :  { %904 = vmatmul.bf16.vlgmr.msrb.gmra.mxu1 %v2189_v32  ;;  %1049 = vmatpush.bf16.msrb.mxu2 %v1703_v29  ;;  %v1702_v32 = vld [vmem:[%s2518_s3 + $0x10] sm:$0xff] }
  0x87   :  { %1065 = vmatpush.bf16.msrb.mxu3 %v1708_v24 }
  0x88   :  { %1050 = vmatpush.bf16.msrb.mxu2 %v1702_v32 }
  0x8c   :  { %1051 = vmatpush.bf16.msrb.mxu2 %v1701_v50 }
  0x90   :  { %1052 = vmatpush.bf16.msrb.mxu2 %v1700_v55 }
  0xa0   :  { %v736_v51 = vpop.f32.mrf.mxu0 }
  0xa1   :  { %v749_v52 = vpop.f32.mrf.mxu1  ;;  %v737_v61 = vadd.f32 %v736_v51, %v138_v57 }
  0xa3   :  { %v750_v63 = vadd.f32 %v749_v52, %v737_v61 }
  0xa8   :  { %v762_v53 = vpop.f32.mrf.mxu2  ;;  %v738_v58 = vpop.f32.mrf.mxu0 }
  0xa9   :  { %v751_v59 = vpop.f32.mrf.mxu1  ;;  %v763_v3 = vadd.f32 %v762_v53, %v750_v63 }
  0xad   :  { %v775_v60 = vpop.f32.mrf.mxu3 }
  0xae   :  { %v776_v4 = vadd.f32 %v775_v60, %v763_v3 }
  0xb0   :  { %v764_v62 = vpop.f32.mrf.mxu2 }
  0xb5   :  { %v777_v0 = vpop.f32.mrf.mxu3 }
  0xc0   :  { %v788_v5 = vpop.f32.mrf.mxu0 }
  0xc1   :  { %v801_v6 = vpop.f32.mrf.mxu1  ;;  %v789_v8 = vadd.f32 %v788_v5, %v776_v4 }
  0xc3   :  { %v802_v10 = vadd.f32 %v801_v6, %v789_v8 }
  0xc8   :  { %v814_v12 = vpop.f32.mrf.mxu2  ;;  %v790_v15 = vpop.f32.mrf.mxu0 }
  0xc9   :  { %v815_v14 = vadd.f32 %v814_v12, %v802_v10  ;;  %v803_v16 = vpop.f32.mrf.mxu1 }
  0xcb   :  { %v909_v17 = vmax.f32 %v815_v14, 0.0 }
  0xcd   :  { %v911_v1 = vpack.c.bf16 %v909_v17, %v909_v17  ;;  %v827_v18 = vpop.f32.mrf.mxu3 }
  0xce   :  { %v828_v30 = vadd.f32 %v827_v18, %v139_v25 }
  0xcf   :  { %1053 = vmatmul.bf16.vlgmr.msrb.gmra.mxu2 %v911_v1 }
  0xd0   :  { %v816_v54 = vpop.f32.mrf.mxu2 }
  0xd5   :  { %v829_v20 = vpop.f32.mrf.mxu3 }
  0xe0   :  { %v840_v22 = vpop.f32.mrf.mxu0 }
  0xe1   :  { %v853_v23 = vpop.f32.mrf.mxu1  ;;  %v841_v33 = vadd.f32 %v840_v22, %v828_v30 }
  0xe3   :  { %v854_v35 = vadd.f32 %v853_v23, %v841_v33 }
  0xe8   :  { %v842_v26 = vpop.f32.mrf.mxu0  ;;  %v866_v28 = vpop.f32.mrf.mxu2 }
  0xe9   :  { %v855_v27 = vpop.f32.mrf.mxu1  ;;  %v867_v37 = vadd.f32 %v866_v28, %v854_v35 }
  0xed   :  { %v879_v31 = vpop.f32.mrf.mxu3 }
  0xee   :  { %v880_v38 = vadd.f32 %v879_v31, %v867_v37 }
  0xf0   :  { %v868_v34 = vpop.f32.mrf.mxu2 }
  0xf5   :  { %v881_v36 = vpop.f32.mrf.mxu3 }
 0x100   :  { %v892_v39 = vpop.f32.mrf.mxu0 }
 0x101   :  { %v893_v40 = vadd.f32 %v892_v39, %v880_v38  ;;  %v905_v41 = vpop.f32.mrf.mxu1 }
 0x103   :  { %v906_v42 = vadd.f32 %v905_v41, %v893_v40 }
 0x105   :  { %v910_v43 = vmax.f32 %v906_v42, 0.0 }
 0x107   :  { %v912_v44 = vpack.c.bf16 %v910_v43, %v910_v43 }
 0x108   :  { %v894_v45 = vpop.f32.mrf.mxu0 }
 0x109   :  { %v907_v46 = vpop.f32.mrf.mxu1  ;;  %1066 = vmatmul.bf16.vlgmr.msrb.gmra.mxu3 %v912_v44 }
 0x152   :  { %v1054_v47 = vpop.f32.mrf.mxu2 }
 0x153   :  { %v1055_v29 = vadd.f32 %v1716_v49, %v1054_v47 }
 0x15a   :  { %v1056_v48 = vpop.f32.mrf.mxu2 }
 0x18c   :  { %v1067_v32 = vpop.f32.mrf.mxu3 }
 0x18d   :  { %v1068_v50 = vadd.f32 %v1067_v32, %v1055_v29 }
 0x18f   :  { %1071 = vst [vmem:[%s2521_s5] sm:$0xff] %v1068_v50 }
 0x194   :  { %v1069_v51 = vpop.f32.mrf.mxu3 }

</bundles_post_ra>
